<compile_context>
chip_gen: v7x
topology: tpu7x:2x2x1
jax: 0.10.0
libtpu: 0.0.40
codegen_flags: <defaults>
</compile_context>

<pallas_src>
import math

import jax
import jax.numpy as jnp
from jax.experimental import pallas as pl
from jax.experimental.pallas import tpu as pltpu

INPUT_DIM = 300 * 3          # 900
EMBED_DIM = 64
NUM_CLASSES = 5


def imu_mlp_kernel(x_ref, w_emb_ref, b_emb_ref,
                   w1_ref, b1_ref, w2_ref, b2_ref,
                   wh_ref, bh_ref, out_ref):
    # Cast x to bf16 in-kernel (no-op if the caller already supplies bf16).
    x = x_ref[...].astype(jnp.bfloat16)                         # (TB, 900)

    # embedding: Linear(input_dim, embed_dim)  -- bf16 MXU, f32 accumulate
    emb = jnp.dot(x, w_emb_ref[...],
                  preferred_element_type=jnp.float32) + b_emb_ref[...]

    # mlp: Linear(embed, hidden) -> ReLU -> Linear(hidden, embed)
    h = jnp.dot(emb.astype(jnp.bfloat16), w1_ref[...],
                preferred_element_type=jnp.float32) + b1_ref[...]
    h = jnp.maximum(h, 0.0)                                     # ReLU in f32
    enc = jnp.dot(h.astype(jnp.bfloat16), w2_ref[...],
                  preferred_element_type=jnp.float32) + b2_ref[...]

    # head: Linear(embed, num_classes) -- store the (TB, 5) logits directly
    out_ref[...] = jnp.dot(enc.astype(jnp.bfloat16), wh_ref[...],
                           preferred_element_type=jnp.float32) + bh_ref[...]


def _round_up(n, m):
    return ((n + m - 1) // m) * m


def _choose_batch_tile(B, batch_tile):
    """Rows per grid step: multiple of 8, >=2 (ideally 4+) grid steps."""
    if B <= 8:
        return B                       # block == full dim satisfies (8,128)
    tb = min(batch_tile, _round_up(pl.cdiv(B, 4), 8))   # aim for >=4 steps
    return max(8, min(tb, _round_up(B, 8)))


def imu_mlp_classifier(x, params, num_classes=NUM_CLASSES, batch_tile=1024):
    """x: (B, 300, 3) float32 (or bfloat16). Returns logits (B, num_classes) f32."""
    (w_emb, b_emb, w1, b1, w2, b2, wh, bh) = params

    B = x.shape[0]
    x_flat = x.reshape(B, -1)                                   # (B, 900), free
    in_dim = x_flat.shape[1]
    assert in_dim == w_emb.shape[0]

    tb = _choose_batch_tile(B, batch_tile)
    grid = (pl.cdiv(B, tb),)

    resident = lambda arr: pl.BlockSpec(arr.shape, lambda i: (0, 0))

    out = pl.pallas_call(
        imu_mlp_kernel,
        out_shape=jax.ShapeDtypeStruct((B, num_classes), jnp.float32),
        grid=grid,
        in_specs=[
            pl.BlockSpec((tb, in_dim), lambda i: (i, 0)),       # x tiles
            resident(w_emb), resident(b_emb),                   # weights stay
            resident(w1), resident(b1),                         # resident in
            resident(w2), resident(b2),                         # VMEM across
            resident(wh), resident(bh),                         # the grid
        ],
        out_specs=pl.BlockSpec((tb, num_classes), lambda i: (i, 0)),
        compiler_params=pltpu.CompilerParams(
            dimension_semantics=("parallel",)),
    )(x_flat, w_emb, b_emb, w1, b1, w2, b2, wh, bh)

    return out


def init_params(key, input_dim=INPUT_DIM, embed_dim=EMBED_DIM,
                num_classes=NUM_CLASSES):
    """bf16 weights in (in, out) layout, f32 (1, out) biases; no padding."""
    hidden_dim = embed_dim * 4
    ks = jax.random.split(key, 8)

    def lin(kw, kb, d_in, d_out):
        bound = 1.0 / math.sqrt(d_in)
        w = jax.random.uniform(kw, (d_in, d_out), jnp.float32, -bound, bound)
        b = jax.random.uniform(kb, (1, d_out), jnp.float32, -bound, bound)
        return w.astype(jnp.bfloat16), b                        # bf16 W, f32 b

    w_emb, b_emb = lin(ks[0], ks[1], input_dim, embed_dim)
    w1, b1 = lin(ks[2], ks[3], embed_dim, hidden_dim)
    w2, b2 = lin(ks[4], ks[5], hidden_dim, embed_dim)
    wh, bh = lin(ks[6], ks[7], embed_dim, num_classes)
    return (w_emb, b_emb, w1, b1, w2, b2, wh, bh)


def reference_forward(x, params):
    """Pure-JAX reference mirroring the kernel's bf16/f32 mixed precision."""
    (w_emb, b_emb, w1, b1, w2, b2, wh, bh) = params
    B = x.shape[0]
    xb = x.reshape(B, -1).astype(jnp.bfloat16)
    emb = jnp.dot(xb, w_emb, preferred_element_type=jnp.float32) + b_emb
    h = jnp.maximum(
        jnp.dot(emb.astype(jnp.bfloat16), w1,
                preferred_element_type=jnp.float32) + b1, 0.0)
    enc = jnp.dot(h.astype(jnp.bfloat16), w2,
                  preferred_element_type=jnp.float32) + b2
    return jnp.dot(enc.astype(jnp.bfloat16), wh,
                   preferred_element_type=jnp.float32) + bh


if __name__ == "__main__":
    key = jax.random.PRNGKey(0)
    k_x, k_p = jax.random.split(key)

    B = 16  # small demo batch; tiling gives a 2-step parallel grid (tb=8)
    x = jax.random.normal(k_x, (B, 300, 3), dtype=jnp.float32)
    params = init_params(k_p)

    out = imu_mlp_classifier(x, params)
    out = jax.block_until_ready(out)

    ref = reference_forward(x, params)
    assert out.shape == (B, NUM_CLASSES), out.shape
    assert jnp.allclose(out, ref, atol=1e-2, rtol=1e-2), "mismatch vs JAX reference"

    print("KERNEL_OK")
</pallas_src>

<mosaic_0001>
module attributes {stable_mosaic.version = 11 : i64} {
  func.func @imu_mlp_kernel(%arg0: i32, %arg1: memref<8x900xf32, #tpu.memory_space<vmem>>, %arg2: memref<900x64xbf16, #tpu.memory_space<vmem>>, %arg3: memref<1x64xf32, #tpu.memory_space<vmem>>, %arg4: memref<64x256xbf16, #tpu.memory_space<vmem>>, %arg5: memref<1x256xf32, #tpu.memory_space<vmem>>, %arg6: memref<256x64xbf16, #tpu.memory_space<vmem>>, %arg7: memref<1x64xf32, #tpu.memory_space<vmem>>, %arg8: memref<64x5xbf16, #tpu.memory_space<vmem>>, %arg9: memref<1x5xf32, #tpu.memory_space<vmem>>, %arg10: memref<8x5xf32, #tpu.memory_space<vmem>>) attributes {dimension_semantics = [#tpu.dimension_semantics<parallel>], iteration_bounds = array<i64: 2>, scalar_prefetch = 0 : i64, scratch_operands = 0 : i64, tpu.core_type = #tpu.core_type<tc>, window_params = [{transform_indices = @transform_0, window_bounds = array<i64: 8, 900>}, {pipeline_mode = #tpu.pipeline_mode<synchronous>, transform_indices = @transform_1, window_bounds = array<i64: 900, 64>}, {pipeline_mode = #tpu.pipeline_mode<synchronous>, transform_indices = @transform_2, window_bounds = array<i64: 1, 64>}, {pipeline_mode = #tpu.pipeline_mode<synchronous>, transform_indices = @transform_3, window_bounds = array<i64: 64, 256>}, {pipeline_mode = #tpu.pipeline_mode<synchronous>, transform_indices = @transform_4, window_bounds = array<i64: 1, 256>}, {pipeline_mode = #tpu.pipeline_mode<synchronous>, transform_indices = @transform_5, window_bounds = array<i64: 256, 64>}, {pipeline_mode = #tpu.pipeline_mode<synchronous>, transform_indices = @transform_6, window_bounds = array<i64: 1, 64>}, {pipeline_mode = #tpu.pipeline_mode<synchronous>, transform_indices = @transform_7, window_bounds = array<i64: 64, 5>}, {pipeline_mode = #tpu.pipeline_mode<synchronous>, transform_indices = @transform_8, window_bounds = array<i64: 1, 5>}, {transform_indices = @transform_9, window_bounds = array<i64: 8, 5>}]} {
    %c0 = arith.constant 0 : index
    %c0_0 = arith.constant 0 : index
    %0 = vector.load %arg1[%c0, %c0_0] : memref<8x900xf32, #tpu.memory_space<vmem>>, vector<8x900xf32>
    %1 = arith.truncf %0 : vector<8x900xf32> to vector<8x900xbf16>
    %c0_1 = arith.constant 0 : index
    %c0_2 = arith.constant 0 : index
    %2 = vector.load %arg2[%c0_1, %c0_2] : memref<900x64xbf16, #tpu.memory_space<vmem>>, vector<900x64xbf16>
    %cst = arith.constant dense<0.000000e+00> : vector<8x64xf32>
    %3 = tpu.matmul %1, %2, %cst {dimension_numbers = #tpu.dot_dimension_numbers<[1], [0], [0], [1], [0, 0, 1, 1], [], []>} : vector<8x900xbf16>, vector<900x64xbf16>, vector<8x64xf32> -> vector<8x64xf32>
    %c0_3 = arith.constant 0 : index
    %c0_4 = arith.constant 0 : index
    %4 = vector.load %arg3[%c0_3, %c0_4] : memref<1x64xf32, #tpu.memory_space<vmem>>, vector<1x64xf32>
    %5 = vector.broadcast %4 : vector<1x64xf32> to vector<8x64xf32>
    %6 = arith.addf %3, %5 : vector<8x64xf32>
    %7 = arith.truncf %6 : vector<8x64xf32> to vector<8x64xbf16>
    %c0_5 = arith.constant 0 : index
    %c0_6 = arith.constant 0 : index
    %8 = vector.load %arg4[%c0_5, %c0_6] : memref<64x256xbf16, #tpu.memory_space<vmem>>, vector<64x256xbf16>
    %cst_7 = arith.constant dense<0.000000e+00> : vector<8x256xf32>
    %9 = tpu.matmul %7, %8, %cst_7 {dimension_numbers = #tpu.dot_dimension_numbers<[1], [0], [0], [1], [0, 0, 1, 1], [], []>} : vector<8x64xbf16>, vector<64x256xbf16>, vector<8x256xf32> -> vector<8x256xf32>
    %c0_8 = arith.constant 0 : index
    %c0_9 = arith.constant 0 : index
    %10 = vector.load %arg5[%c0_8, %c0_9] : memref<1x256xf32, #tpu.memory_space<vmem>>, vector<1x256xf32>
    %11 = vector.broadcast %10 : vector<1x256xf32> to vector<8x256xf32>
    %12 = arith.addf %9, %11 : vector<8x256xf32>
    %cst_10 = arith.constant 0.000000e+00 : f32
    %13 = vector.broadcast %cst_10 : f32 to vector<8x256xf32>
    %14 = arith.maximumf %12, %13 : vector<8x256xf32>
    %15 = arith.truncf %14 : vector<8x256xf32> to vector<8x256xbf16>
    %c0_11 = arith.constant 0 : index
    %c0_12 = arith.constant 0 : index
    %16 = vector.load %arg6[%c0_11, %c0_12] : memref<256x64xbf16, #tpu.memory_space<vmem>>, vector<256x64xbf16>
    %cst_13 = arith.constant dense<0.000000e+00> : vector<8x64xf32>
    %17 = tpu.matmul %15, %16, %cst_13 {dimension_numbers = #tpu.dot_dimension_numbers<[1], [0], [0], [1], [0, 0, 1, 1], [], []>} : vector<8x256xbf16>, vector<256x64xbf16>, vector<8x64xf32> -> vector<8x64xf32>
    %c0_14 = arith.constant 0 : index
    %c0_15 = arith.constant 0 : index
    %18 = vector.load %arg7[%c0_14, %c0_15] : memref<1x64xf32, #tpu.memory_space<vmem>>, vector<1x64xf32>
    %19 = vector.broadcast %18 : vector<1x64xf32> to vector<8x64xf32>
    %20 = arith.addf %17, %19 : vector<8x64xf32>
    %21 = arith.truncf %20 : vector<8x64xf32> to vector<8x64xbf16>
    %c0_16 = arith.constant 0 : index
    %c0_17 = arith.constant 0 : index
    %22 = vector.load %arg8[%c0_16, %c0_17] : memref<64x5xbf16, #tpu.memory_space<vmem>>, vector<64x5xbf16>
    %cst_18 = arith.constant dense<0.000000e+00> : vector<8x5xf32>
    %23 = tpu.matmul %21, %22, %cst_18 {dimension_numbers = #tpu.dot_dimension_numbers<[1], [0], [0], [1], [0, 0, 1, 1], [], []>} : vector<8x64xbf16>, vector<64x5xbf16>, vector<8x5xf32> -> vector<8x5xf32>
    %c0_19 = arith.constant 0 : index
    %c0_20 = arith.constant 0 : index
    %24 = vector.load %arg9[%c0_19, %c0_20] : memref<1x5xf32, #tpu.memory_space<vmem>>, vector<1x5xf32>
    %25 = vector.broadcast %24 : vector<1x5xf32> to vector<8x5xf32>
    %26 = arith.addf %23, %25 : vector<8x5xf32>
    %c0_21 = arith.constant 0 : index
    %c0_22 = arith.constant 0 : index
    %27 = vector.load %arg10[%c0_21, %c0_22] : memref<8x5xf32, #tpu.memory_space<vmem>>, vector<8x5xf32>
    tpu.vector_store %arg10[%c0_21, %c0_22], %26 {strides = array<i32>} : memref<8x5xf32, #tpu.memory_space<vmem>>, vector<8x5xf32>,
    return
  }
  func.func @transform_0(%arg0: i32) -> (i32, i32) {
    %c0_i32 = arith.constant 0 : i32
    %c0_i32_0 = arith.constant 0 : i32
    return %arg0, %c0_i32 : i32, i32
  }
  func.func @transform_1(%arg0: i32) -> (i32, i32) {
    %c0_i32 = arith.constant 0 : i32
    %c0_i32_0 = arith.constant 0 : i32
    %c0_i32_1 = arith.constant 0 : i32
    return %c0_i32, %c0_i32_0 : i32, i32
  }
  func.func @transform_2(%arg0: i32) -> (i32, i32) {
    %c0_i32 = arith.constant 0 : i32
    %c0_i32_0 = arith.constant 0 : i32
    %c0_i32_1 = arith.constant 0 : i32
    return %c0_i32, %c0_i32_0 : i32, i32
  }
  func.func @transform_3(%arg0: i32) -> (i32, i32) {
    %c0_i32 = arith.constant 0 : i32
    %c0_i32_0 = arith.constant 0 : i32
    %c0_i32_1 = arith.constant 0 : i32
    return %c0_i32, %c0_i32_0 : i32, i32
  }
  func.func @transform_4(%arg0: i32) -> (i32, i32) {
    %c0_i32 = arith.constant 0 : i32
    %c0_i32_0 = arith.constant 0 : i32
    %c0_i32_1 = arith.constant 0 : i32
    return %c0_i32, %c0_i32_0 : i32, i32
  }
  func.func @transform_5(%arg0: i32) -> (i32, i32) {
    %c0_i32 = arith.constant 0 : i32
    %c0_i32_0 = arith.constant 0 : i32
    %c0_i32_1 = arith.constant 0 : i32
    return %c0_i32, %c0_i32_0 : i32, i32
  }
  func.func @transform_6(%arg0: i32) -> (i32, i32) {
    %c0_i32 = arith.constant 0 : i32
    %c0_i32_0 = arith.constant 0 : i32
    %c0_i32_1 = arith.constant 0 : i32
    return %c0_i32, %c0_i32_0 : i32, i32
  }
  func.func @transform_7(%arg0: i32) -> (i32, i32) {
    %c0_i32 = arith.constant 0 : i32
    %c0_i32_0 = arith.constant 0 : i32
    %c0_i32_1 = arith.constant 0 : i32
    return %c0_i32, %c0_i32_0 : i32, i32
  }
  func.func @transform_8(%arg0: i32) -> (i32, i32) {
    %c0_i32 = arith.constant 0 : i32
    %c0_i32_0 = arith.constant 0 : i32
    %c0_i32_1 = arith.constant 0 : i32
    return %c0_i32, %c0_i32_0 : i32, i32
  }
  func.func @transform_9(%arg0: i32) -> (i32, i32) {
    %c0_i32 = arith.constant 0 : i32
    %c0_i32_0 = arith.constant 0 : i32
    return %arg0, %c0_i32 : i32, i32
  }
}

</mosaic_0001>

<bundles_post_ra>
// kernel: tpu_custom_call.1
= control target key start
LH: loop header
LB: loop body
LE: loop exit
PB: predicated region body
PF: predicated region fallthrough
CT: control target
= control target key end

     0   :  { %s1766_s30 = smov 0   ;;  %s2080_s0 = inlined_call_operand.vmem [shape: f32[16,900], index: 0, kind: input, shape index: {}]   ;;  %s2081_s1 = inlined_call_operand.vmem [shape: bf16[900,64], index: 1, kind: input, shape index: {}]   ;;  %s2082_s2 = inlined_call_operand.vmem [shape: f32[1,64], index: 2, kind: input, shape index: {}]   ;;  %s2083_s3 = inlined_call_operand.vmem [shape: bf16[64,256], index: 3, kind: input, shape index: {}]   ;;  %s2084_s4 = inlined_call_operand.vmem [shape: f32[1,256], index: 4, kind: input, shape index: {}]   ;;  %s2085_s5 = inlined_call_operand.vmem [shape: bf16[256,64], index: 5, kind: input, shape index: {}]   ;;  %s2086_s6 = inlined_call_operand.vmem [shape: f32[1,64], index: 6, kind: input, shape index: {}]   ;;  %s2087_s7 = inlined_call_operand.vmem [shape: bf16[64,5], index: 7, kind: input, shape index: {}]   ;;  %s2088_s8 = inlined_call_operand.vmem [shape: f32[1,5], index: 8, kind: input, shape index: {}]   ;;  %s2089_s9 = inlined_call_operand.vmem [shape: f32[16,5], index: 9, kind: output, shape index: {}]  }
   0x1 LB: > { %s1398_s10 = sadd.s32 4294967295, %s1711_s30   ;;  %p1402_p0 = scmp.ge.s32.totalorder %s1711_s30, 1  ;;  %s1711_s30 = sphi %s1766_s30, %s19_s30  }
   0x2   : > { %p287_p1 = scmp.lt.s32.totalorder %s1711_s30, 3 }
   0x4   : > { %p288_p2 = pnand %p1402_p0, %p287_p1 }
   0x5   : > { %v1616_v0 = vld [vmem:[%s2081_s1 + $0x40] sm:$0xff] (!%p288_p2)   ;;  %v1620_v4 = vld [vmem:[%s2081_s1 + $0x48] sm:$0xff] (!%p288_p2)   ;;  %v1624_v8 = vld [vmem:[%s2081_s1 + $0x50] sm:$0xff] (!%p288_p2)   ;;  %p322_p3 = scmp.lt.s32.totalorder (!%p288_p2), %s1398_s10, 1  ;;  %v1713_v41 = vmov (!%p288_p2), 0   ;;  %vm811_vm0 = vcmask (!%p288_p2), 1041408  }
   0x6   : > { %291 = sbr.rel (%p288_p2) target bundleno = 946 (0x3b2), region = 56  ;;  %v1617_v1 = vld [vmem:[%s2081_s1 + $0xc0] sm:$0xff] (!%p288_p2)   ;;  %1500 = vmatprep.subr.bf16.mxu0 (!%p288_p2), %v1616_v0  ;;  %v1621_v5 = vld [vmem:[%s2081_s1 + $0xc8] sm:$0xff] (!%p288_p2)   ;;  %v1625_v9 = vld [vmem:[%s2081_s1 + $0xd0] sm:$0xff] (!%p288_p2)   ;;  %vm807_vm1 = vcmask (!%p288_p2), 31744   ;;  %vm1036_vm2 = vcmask (!%p288_p2), 523264  }
   0x7   : > { %v1618_v2 = vld [vmem:[%s2081_s1] sm:$0xff] (!%p288_p2)   ;;  %1522 = vmatprep.subr.bf16.mxu1 (!%p288_p2), %v1617_v1  ;;  %v1622_v6 = vld [vmem:[%s2081_s1 + $0x8] sm:$0xff] (!%p288_p2)   ;;  %v1626_v10 = vld [vmem:[%s2081_s1 + $0x10] sm:$0xff] (!%p288_p2)   ;;  %vm1715_vm3 = vmmov (!%p288_p2), 0   ;;  %vm1343_vm4 = vcmask (!%p288_p2), 39936  }
   0x8   : > { %v1619_v3 = vld [vmem:[%s2081_s1 + $0x80] sm:$0xff] (!%p288_p2)   ;;  %1501 = vmatpush3.bf16.msra.mxu0 (!%p288_p2), %v1618_v2  ;;  %v1623_v7 = vld [vmem:[%s2081_s1 + $0x88] sm:$0xff] (!%p288_p2)   ;;  %v1627_v11 = vld [vmem:[%s2081_s1 + $0x90] sm:$0xff] (!%p288_p2)  }
   0x9   : > { %1523 = vmatpush3.bf16.msra.mxu1 (!%p288_p2), %v1619_v3  ;;  %1502 = vmatprep.subr.bf16.mxu0 (!%p288_p2), %v1620_v4  ;;  %v1628_v12 = vld [vmem:[%s2081_s1 + $0x58] sm:$0xff] (!%p288_p2)   ;;  %v1632_v16 = vld [vmem:[%s2081_s1 + $0x60] sm:$0xff] (!%p288_p2)   ;;  %v1636_v20 = vld [vmem:[%s2081_s1 + $0x68] sm:$0xff] (!%p288_p2)  }
   0xa   : > { %1524 = vmatprep.subr.bf16.mxu1 (!%p288_p2), %v1621_v5  ;;  %v1629_v13 = vld [vmem:[%s2081_s1 + $0xd8] sm:$0xff] (!%p288_p2)   ;;  %v1633_v17 = vld [vmem:[%s2081_s1 + $0xe0] sm:$0xff] (!%p288_p2)   ;;  %v1637_v21 = vld [vmem:[%s2081_s1 + $0xe8] sm:$0xff] (!%p288_p2)  }
   0xb   : > { %v1630_v14 = vld [vmem:[%s2081_s1 + $0x18] sm:$0xff] (!%p288_p2)   ;;  %v1634_v18 = vld [vmem:[%s2081_s1 + $0x20] sm:$0xff] (!%p288_p2)   ;;  %v1638_v22 = vld [vmem:[%s2081_s1 + $0x28] sm:$0xff] (!%p288_p2)  }
   0xc   : > { %1503 = vmatpush3.bf16.msra.mxu0 (!%p288_p2), %v1622_v6  ;;  %v1631_v15 = vld [vmem:[%s2081_s1 + $0x98] sm:$0xff] (!%p288_p2)   ;;  %v1635_v19 = vld [vmem:[%s2081_s1 + $0xa0] sm:$0xff] (!%p288_p2)   ;;  %v1639_v23 = vld [vmem:[%s2081_s1 + $0xa8] sm:$0xff] (!%p288_p2)  }
   0xd   : > { %1525 = vmatpush3.bf16.msra.mxu1 %v1623_v7  ;;  %1504 = vmatprep.subr.bf16.mxu0 %v1624_v8  ;;  %s2091_s10 = smov (!%p322_p3, %s1398_s10), 1  ;;  %v1640_v24 = vld [vmem:[%s2081_s1 + $0x70] sm:$0xff]   ;;  %v1644_v28 = vld [vmem:[%s2081_s1 + $0x78] sm:$0xff]   ;;  %v1648_v40 = vld [vmem:[%s2081_s1 + $0x140] sm:$0xff]  }
   0xe   : > { %1526 = vmatprep.subr.bf16.mxu1 %v1625_v9  ;;  %v1641_v25 = vld [vmem:[%s2081_s1 + $0xf0] sm:$0xff]   ;;  %s1499_s27 = sshll.u32 %s2091_s10, 6  ;;  %v1645_v29 = vld [vmem:[%s2081_s1 + $0xf8] sm:$0xff]   ;;  %v1649_v42 = vld [vmem:[%s2081_s1 + $0x100] sm:$0xff]   ;;  %s1405_s22 = sshll.u32 %s2091_s10, 3 }
   0xf   : > { %v1642_v26 = vld [vmem:[%s2081_s1 + $0x30] sm:$0xff]   ;;  %s1874_s17 = scalar_lea.vmem %s2080_s0, %s1499_s27  ;;  %v1646_v30 = vld [vmem:[%s2081_s1 + $0x38] sm:$0xff]   ;;  %v1650_v43 = vld [vmem:[%s2081_s1 + $0x180] sm:$0xff]   ;;  %s330_s27 = scalar_lea.vmem %s2089_s9, %s1405_s22 }
  0x10   : > { %1505 = vmatpush3.bf16.msra.mxu0 %v1626_v10  ;;  %v1643_v27 = vld [vmem:[%s2081_s1 + $0xb0] sm:$0xff]   ;;  %v1647_v31 = vld [vmem:[%s2081_s1 + $0xb8] sm:$0xff]   ;;  %v333_v32 = vld [vmem:[%s1874_s17 + $0x8] sm:$0xff] }
  0x11   : > { %1527 = vmatpush3.bf16.msra.mxu1 %v1627_v11  ;;  %1506 = vmatprep.subr.bf16.mxu0 %v1628_v12  ;;  %v335_v33 = vld [vmem:[%s1874_s17 + $0x18] sm:$0xff]  ;;  %v332_v34 = vld [vmem:[%s1874_s17] sm:$0xff]  ;;  %v341_v35 = vpack.c.bf16 %v333_v32, %v333_v32  ;;  %v334_v38 = vld [vmem:[%s1874_s17 + $0x10] sm:$0xff] }
  0x12   : > { %1528 = vmatprep.subr.bf16.mxu1 %v1629_v13  ;;  %v343_v36 = vpack.c.bf16 %v335_v33, %v335_v33  ;;  %v340_v37 = vpack.c.bf16 %v332_v34, %v332_v34  ;;  %v342_v39 = vpack.c.bf16 %v334_v38, %v334_v38  ;;  %v1651_v44 = vld [vmem:[%s2081_s1 + $0x148] sm:$0xff]   ;;  %v1654_v47 = vld [vmem:[%s2081_s1 + $0x150] sm:$0xff]   ;;  %v1657_v50 = vld [vmem:[%s2081_s1 + $0x158] sm:$0xff]  }
  0x13   : > { %847 = vmatprep.mubr.bf16.mxu0 %v341_v35  ;;  %v1652_v45 = vld [vmem:[%s2081_s1 + $0x108] sm:$0xff]   ;;  %v1655_v48 = vld [vmem:[%s2081_s1 + $0x110] sm:$0xff]   ;;  %v1658_v51 = vld [vmem:[%s2081_s1 + $0x118] sm:$0xff]  }
  0x14   : > { %1507 = vmatpush3.bf16.msra.mxu0 %v1630_v14  ;;  %887 = vmatprep.mubr.bf16.mxu1 %v343_v36  ;;  %v1653_v46 = vld [vmem:[%s2081_s1 + $0x188] sm:$0xff]   ;;  %v1656_v49 = vld [vmem:[%s2081_s1 + $0x190] sm:$0xff]   ;;  %v1659_v52 = vld [vmem:[%s2081_s1 + $0x198] sm:$0xff]  }
  0x15   : > { %1529 = vmatpush3.bf16.msra.mxu1 %v1631_v15  ;;  %1508 = vmatprep.subr.bf16.mxu0 %v1632_v16  ;;  %v1660_v53 = vld [vmem:[%s2081_s1 + $0x160] sm:$0xff]   ;;  %v1663_v56 = vld [vmem:[%s2081_s1 + $0x168] sm:$0xff]   ;;  %v1666_v59 = vld [vmem:[%s2081_s1 + $0x170] sm:$0xff]  }
  0x16   : > { %1530 = vmatprep.subr.bf16.mxu1 %v1633_v17  ;;  %v1661_v54 = vld [vmem:[%s2081_s1 + $0x120] sm:$0xff]   ;;  %v1664_v57 = vld [vmem:[%s2081_s1 + $0x128] sm:$0xff]   ;;  %v1667_v60 = vld [vmem:[%s2081_s1 + $0x130] sm:$0xff]  }
  0x17   : > { %v1662_v55 = vld [vmem:[%s2081_s1 + $0x1a0] sm:$0xff]   ;;  %v1665_v58 = vld [vmem:[%s2081_s1 + $0x1a8] sm:$0xff]   ;;  %v1668_v61 = vld [vmem:[%s2081_s1 + $0x1b0] sm:$0xff]  }
  0x18   : > { %1509 = vmatpush3.bf16.msra.mxu0 %v1634_v18  ;;  %v337_v62 = vld [vmem:[%s1874_s17 + $0x28] sm:$0xff]  ;;  %v1672_v0 = vld [vmem:[%s2081_s1 + $0x1c0] ss:$0 sps:$4 sm:$0x33]   ;;  %v339_v1 = vld [vmem:[%s1874_s17 + $0x38] sm:$0xff] }
  0x19   : > { %1531 = vmatpush3.bf16.msra.mxu1 %v1635_v19  ;;  %1510 = vmatprep.subr.bf16.mxu0 %v1636_v20  ;;  %v345_v63 = vpack.c.bf16 %v337_v62, %v337_v62  ;;  %v1669_v2 = vld [vmem:[%s2081_s1 + $0x178] sm:$0xff]   ;;  %v347_v3 = vpack.c.bf16 %v339_v1, %v339_v1  ;;  %v336_v6 = vld [vmem:[%s1874_s17 + $0x20] sm:$0xff]  ;;  %v813_v7 = vsel %vm811_vm0, %v1672_v0, 0  ;;  %v338_v8 = vld [vmem:[%s1874_s17 + $0x30] sm:$0xff] }
  0x1a   : > { %1532 = vmatprep.subr.bf16.mxu1 %v1637_v21  ;;  %v1670_v4 = vld [vmem:[%s2081_s1 + $0x138] sm:$0xff]   ;;  %v344_v9 = vpack.c.bf16 %v336_v6, %v336_v6  ;;  %v346_v10 = vpack.c.bf16 %v338_v8, %v338_v8  ;;  %v1673_v11 = vld [vmem:[%s2083_s3] ss:$8 sps:$4 sm:$0xff]   ;;  %v1675_v12 = vld [vmem:[%s2083_s3 + $0x4] ss:$8 sps:$4 sm:$0xff]  }
  0x1b   : > { %v1671_v5 = vld [vmem:[%s2081_s1 + $0x1b8] sm:$0xff]   ;;  %v1681_v15 = vld [vmem:[%s2083_s3 + $0x24] ss:$8 sps:$4 sm:$0xff]   ;;  %v1679_v16 = vld [vmem:[%s2083_s3 + $0x20] ss:$8 sps:$4 sm:$0xff]  }
  0x1c   : > { %1511 = vmatpush3.bf16.msra.mxu0 %v1638_v22  ;;  %v1678_v13 = vld [vmem:[%s2083_s3 + $0x14] ss:$8 sps:$4 sm:$0xff]   ;;  %v1676_v14 = vld [vmem:[%s2083_s3 + $0x10] ss:$8 sps:$4 sm:$0xff]   ;;  %v1685_v19 = vld [vmem:[%s2085_s5 + $0x40] sm:$0xff]  }
  0x1d   : > { %1533 = vmatpush3.bf16.msra.mxu1 %v1639_v23  ;;  %1512 = vmatprep.subr.bf16.mxu0 %v1640_v24  ;;  %v1684_v17 = vld [vmem:[%s2083_s3 + $0x34] ss:$8 sps:$4 sm:$0xff]   ;;  %v1682_v18 = vld [vmem:[%s2083_s3 + $0x30] ss:$8 sps:$4 sm:$0xff]   ;;  %v1686_v20 = vld [vmem:[%s2085_s5] sm:$0xff]  }
  0x1e   : > { %1534 = vmatprep.subr.bf16.mxu1 %v1641_v25  ;;  %v1687_v21 = vld [vmem:[%s2085_s5 + $0x48] sm:$0xff]   ;;  %v1689_v23 = vld [vmem:[%s2085_s5 + $0x50] sm:$0xff]   ;;  %v1691_v25 = vld [vmem:[%s2085_s5 + $0x58] sm:$0xff]  }
  0x1f   : > { %v1688_v22 = vld [vmem:[%s2085_s5 + $0x8] sm:$0xff]   ;;  %v1690_v24 = vld [vmem:[%s2085_s5 + $0x10] sm:$0xff]   ;;  %v1406_v33 = vld [vmem:[%s2082_s2] ss:$0 sm:$0xff] }
  0x20   : > { %1513 = vmatpush3.bf16.msra.mxu0 %v1642_v26  ;;  %v1692_v26 = vld [vmem:[%s2085_s5 + $0x18] sm:$0xff]   ;;  %v1702_v62 = vld [vmem:[%s2087_s7 + $0x8] sm:$0xff]  }
  0x21   : > { %1535 = vmatpush3.bf16.msra.mxu1 %v1643_v27  ;;  %1514 = vmatprep.subr.bf16.mxu0 %v1644_v28  ;;  %v1693_v27 = vld [vmem:[%s2085_s5 + $0x60] sm:$0xff]  }
  0x22   : > { %1536 = vmatprep.subr.bf16.mxu1 %v1645_v29  ;;  %v1694_v28 = vld [vmem:[%s2085_s5 + $0x20] sm:$0xff]   ;;  %v1695_v29 = vld [vmem:[%s2085_s5 + $0x68] sm:$0xff]  }
  0x24   : > { %1515 = vmatpush3.bf16.msra.mxu0 %v1646_v30  ;;  %v1696_v30 = vld [vmem:[%s2085_s5 + $0x28] sm:$0xff]  }
  0x25   : > { %1537 = vmatpush3.bf16.msra.mxu1 %v1647_v31  ;;  %1544 = vmatprep.subr.bf16.mxu0 %v1648_v40 }
  0x26   : > { %935 = vmatprep.subr.bf16.mxu1 %v1713_v41 }
  0x27   : > { %848 = vmatmul.mubr.bf16.vlgmr.msra.gmra.mrb[0].mxu0 %v340_v37 }
  0x28   : > { %888 = vmatmul.mubr.bf16.vlgmr.msra.gmra.mrb[0].mxu1 %v342_v39  ;;  %1545 = vmatpush3.bf16.msra.mxu0 %v1649_v42 }
  0x29   : > { %936 = vmatpush1.bf16.msra.mxu1 %v1650_v43  ;;  %1546 = vmatprep.subr.bf16.mxu0 %v1651_v44 }
  0x2a   : > { %937 = vmatprep.subr.bf16.mxu1 %v1713_v41  ;;  %927 = vmatprep.mubr.bf16.mxu0 %v345_v63  ;;  %v986_v63 = vlaneseq }
  0x2b   : > { %1464 = vmatprep.mubr.msk.bf16.mxu1 %vm807_vm1, %v347_v3 }
  0x2c   : > { %1547 = vmatpush3.bf16.msra.mxu0 %v1652_v45  ;;  %v987_v0 = vshrl.u32 %v986_v63, 7 }
  0x2d   : > { %938 = vmatpush1.bf16.msra.mxu1 %v1653_v46  ;;  %1548 = vmatprep.subr.bf16.mxu0 %v1654_v47 }
  0x2e   : > { %939 = vmatprep.subr.bf16.mxu1 %v1713_v41  ;;  %v988_v1 = vsub.s32 0, %v987_v0  ;;  %v992_v3 = vsub.s32 1, %v987_v0 }
  0x30   : > { %1549 = vmatpush3.bf16.msra.mxu0 %v1655_v48 }
  0x31   : > { %940 = vmatpush1.bf16.msra.mxu1 %v1656_v49  ;;  %1550 = vmatprep.subr.bf16.mxu0 %v1657_v50 }
  0x32   : > { %941 = vmatprep.subr.bf16.mxu1 %v1713_v41 }
  0x34   : > { %1551 = vmatpush3.bf16.msra.mxu0 %v1658_v51 }
  0x35   : > { %942 = vmatpush1.bf16.msra.mxu1 %v1659_v52  ;;  %1552 = vmatprep.subr.bf16.mxu0 %v1660_v53 }
  0x36   : > { %943 = vmatprep.subr.bf16.mxu1 %v1713_v41 }
  0x38   : > { %1553 = vmatpush3.bf16.msra.mxu0 %v1661_v54 }
  0x39   : > { %944 = vmatpush1.bf16.msra.mxu1 %v1662_v55  ;;  %1554 = vmatprep.subr.bf16.mxu0 %v1663_v56  ;;  %v1697_v56 = vld [vmem:[%s2085_s5 + $0x70] sm:$0xff]  }
  0x3a   : > { %945 = vmatprep.subr.bf16.mxu1 %v1713_v41 }
  0x3c   : > { %1555 = vmatpush3.bf16.msra.mxu0 %v1664_v57  ;;  %v1698_v57 = vld [vmem:[%s2085_s5 + $0x30] sm:$0xff]  }
  0x3d   : > { %946 = vmatpush1.bf16.msra.mxu1 %v1665_v58  ;;  %1556 = vmatprep.subr.bf16.mxu0 %v1666_v59  ;;  %v1699_v58 = vld [vmem:[%s2085_s5 + $0x78] sm:$0xff]  }
  0x3e   : > { %947 = vmatprep.subr.bf16.mxu1 %v1713_v41  ;;  %v1700_v59 = vld [vmem:[%s2085_s5 + $0x38] sm:$0xff]  }
  0x40   : > { %1557 = vmatpush3.bf16.msra.mxu0 %v1667_v60  ;;  %v1701_v60 = vld [vmem:[%s2087_s7] sm:$0xff]  }
  0x41   : > { %948 = vmatpush1.bf16.msra.mxu1 %v1668_v61  ;;  %1558 = vmatprep.subr.bf16.mxu0 %v1669_v2  ;;  %v1714_v61 = vmov 0.0   ;;  %v984_v2 = vld [vmem:[%s2084_s4] sm:$0x3] }
  0x42   : > { %949 = vmatprep.subr.bf16.mxu1 %v1713_v41 }
  0x44   : > { %1559 = vmatpush3.bf16.msra.mxu0 %v1670_v4  ;;  %v989_v4 = vrot.slane %v984_v2, %v988_v1 }
  0x45   : > { %950 = vmatpush1.bf16.msra.mxu1 %v1671_v5  ;;  %1040 = vmatprep.subr.bf16.mxu0 %v1675_v12  ;;  %v993_v5 = vrot.slane %v984_v2, %v992_v3 }
  0x46   : > { %951 = vmatprep.subr.bf16.mxu1 %v1713_v41 }
  0x47   : > { %928 = vmatmul.mubr.bf16.vlgmr.msra.gmra.mrb[4].mxu0 %v344_v9 }
  0x48   : > { %1072 = vmatprep.mubr.bf16.mxu0 %v1713_v41  ;;  %1041 = vmatpush1.bf16.msra.mxu0 %v1673_v11 }
  0x49   : > { %952 = vmatpush1.bf16.msra.mxu1 %v813_v7  ;;  %1042 = vmatprep.subr.bf16.mxu0 %v1678_v13 }
  0x4a   : > { %1566 = vmatprep.subr.bf16.mxu1 %v1685_v19  ;;  %v1474_v19 = vld [vmem:[%s2086_s6] ss:$0 sm:$0xff] }
  0x4c   : > { %968 = vmatmul.mubr.bf16.vlgmr.msra.gmra.mrb[4].mxu1 %v346_v10  ;;  %1043 = vmatpush1.bf16.msra.mxu0 %v1676_v14 }
  0x4d   : > { %1044 = vmatprep.subr.bf16.mxu0 %v1681_v15  ;;  %1567 = vmatpush3.bf16.msra.mxu1 %v1686_v20 }
  0x4e   : > { %1568 = vmatprep.subr.bf16.mxu1 %v1687_v21 }
  0x50   : > { %1045 = vmatpush1.bf16.msra.mxu0 %v1679_v16  ;;  %v1703_v16 = vld [vmem:[%s2087_s7 + $0x10] sm:$0xff]  }
  0x51   : > { %1046 = vmatprep.subr.bf16.mxu0 %v1684_v17  ;;  %1569 = vmatpush3.bf16.msra.mxu1 %v1688_v22  ;;  %v1704_v17 = vld [vmem:[%s2087_s7 + $0x18] sm:$0xff]  }
  0x52   : > { %1570 = vmatprep.subr.bf16.mxu1 %v1689_v23 }
  0x54   : > { %1047 = vmatpush1.bf16.msra.mxu0 %v1682_v18 }
  0x55   : > { %1571 = vmatpush3.bf16.msra.mxu1 %v1690_v24  ;;  %1593 = vmatprep.subr.bf16.mxu0 %v1714_v61 }
  0x56   : > { %1572 = vmatprep.subr.bf16.mxu1 %v1691_v25 }
  0x59   : > { %1573 = vmatpush3.bf16.msra.mxu1 %v1692_v26  ;;  %v1491_v26 = vld [vmem:[%s2088_s8] ss:$0 sm:$0xff] }
  0x5a   : > { %1574 = vmatprep.subr.bf16.mxu1 %v1693_v27 }
  0x5d   : > { %1575 = vmatpush3.bf16.msra.mxu1 %v1694_v28 }
  0x5e   : > { %1576 = vmatprep.subr.bf16.mxu1 %v1695_v29 }
  0x61   : > { %1577 = vmatpush3.bf16.msra.mxu1 %v1696_v30 }
  0x62   : > { %1578 = vmatprep.subr.bf16.mxu1 %v1697_v56 }
  0x65   : > { %1579 = vmatpush3.bf16.msra.mxu1 %v1698_v57 }
  0x66   : > { %1580 = vmatprep.subr.bf16.mxu1 %v1699_v58 }
  0x69   : > { %1581 = vmatpush3.bf16.msra.mxu1 %v1700_v59 }
  0xfa   : > { %v1516_v31 = vpop.f32.mrb[0].mxu0 }
  0xfb   : > { %v1538_v32 = vpop.f32.mrb[0].mxu1  ;;  %v1517_v34 = vpop.f32.mrb[1].mxu0 }
  0xfc   : > { %v1539_v35 = vpop.f32.mrb[1].mxu1  ;;  %v1518_v36 = vadd.f32 %v1517_v34, %v1516_v31  ;;  %v1519_v38 = vpop.f32.mrb[2].mxu0 }
  0xfd   : > { %v1540_v37 = vadd.f32 %v1539_v35, %v1538_v32  ;;  %v1541_v39 = vpop.f32.mrb[2].mxu1  ;;  %v1520_v40 = vpop.f32.mrb[3].mxu0 }
  0xfe   : > { %v1542_v41 = vpop.f32.mrb[3].mxu1  ;;  %v850_v42 = vadd.f32 %v1518_v36, %v1406_v33 }
 0x100   : > { %v890_v43 = vadd.f32 %v1540_v37, %v850_v42 }
 0x11a   : > { %v1560_v44 = vpop.f32.mrb[4].mxu0 }
 0x11b   : > { %v1561_v45 = vpop.f32.mrb[5].mxu0 }
 0x11c   : > { %v1562_v46 = vadd.f32 %v1561_v45, %v1560_v44  ;;  %v1563_v47 = vpop.f32.mrb[6].mxu0 }
 0x11d   : > { %v1564_v48 = vpop.f32.mrb[7].mxu0 }
 0x11e   : > { %v930_v49 = vadd.f32 %v1562_v46, %v890_v43 }
 0x11f   : > { %v969_v50 = vpop.f32.mrb[4].mxu1 }
 0x120   : > { %v971_v51 = vpop.f32.mrb[5].mxu1  ;;  %v970_v52 = vadd.f32 %v969_v50, %v930_v49 }
 0x121   : > { %v972_v53 = vpop.f32.mrb[6].mxu1 }
 0x122   : > { %v973_v54 = vpop.f32.mrb[7].mxu1  ;;  %v975_v55 = vpack.c.bf16 %v970_v52, %v970_v52 }
 0x124   : > { %1473 = vmatmul.mubr.msk.bf16.vlgmr.msra.gmra.mrb[8].mxu0 %vm1036_vm2, %v975_v55 }
 0x125   : > { %1594 = vmatpush3.bf16.msra.mxu0 %v1701_v60  ;;  %1601 = vmatprep.mubr.msk.bf16.mxu0 %vm1715_vm3, %v1714_v61 }
 0x126   : > { %1595 = vmatprep.subr.bf16.mxu0 %v1714_v61 }
 0x129   : > { %1596 = vmatpush3.bf16.msra.mxu0 %v1702_v62 }
 0x12a   : > { %1597 = vmatprep.subr.bf16.mxu0 %v1714_v61 }
 0x12d   : > { %1598 = vmatpush3.bf16.msra.mxu0 %v1703_v16 }
 0x12e   : > { %1599 = vmatprep.subr.bf16.mxu0 %v1714_v61 }
 0x131   : > { %1600 = vmatpush3.bf16.msra.mxu0 %v1704_v17 }
 0x1f7   : > { %v1074_v6 = vpop.f32.mrb[8].mxu0 }
 0x1f8   : > { %v1075_v7 = vadd.f32 %v1074_v6, %v989_v4  ;;  %v1076_v8 = vpop.f32.mrb[9].mxu0 }
 0x1f9   : > { %v1077_v9 = vadd.f32 %v1076_v8, %v993_v5  ;;  %v1078_v10 = vpop.f32.mrb[10].mxu0 }
 0x1fa   : > { %v1081_v11 = vmax.f32 %v1075_v7, 0.0  ;;  %v1079_v12 = vpop.f32.mrb[11].mxu0 }
 0x1fb   : > { %v1082_v13 = vmax.f32 %v1077_v9, 0.0 }
 0x1fc   : > { %v1083_v15 = vpack.c.bf16 %v1081_v11, %v1081_v11 }
 0x1fd   : > { %v1084_v14 = vpack.c.bf16 %v1082_v13, %v1082_v13 }
 0x1ff   : > { %1252 = vmatprep.mubr.bf16.mxu1 %v1084_v14 }
 0x200   : > { %1253 = vmatmul.mubr.bf16.vlgmr.msra.gmra.mrb[8].mxu1 %v1083_v15 }
 0x2d3   : > { %v1582_v18 = vpop.f32.mrb[8].mxu1 }
 0x2d4   : > { %v1583_v20 = vpop.f32.mrb[9].mxu1 }
 0x2d5   : > { %v1584_v21 = vadd.f32 %v1583_v20, %v1582_v18  ;;  %v1585_v22 = vpop.f32.mrb[10].mxu1 }
 0x2d6   : > { %v1586_v23 = vpop.f32.mrb[11].mxu1 }
 0x2d7   : > { %v1255_v24 = vadd.f32 %v1584_v21, %v1474_v19 }
 0x2d9   : > { %v1260_v25 = vpack.c.bf16 %v1255_v24, %v1255_v24 }
 0x2db   : > { %1602 = vmatmul.mubr.msk.bf16.vlgmr.msra.gmra.mrb[12].mxu0 %vm1036_vm2, %v1260_v25 }
 0x3ae   : > { %v1337_v27 = vpop.f32.mrb[12].mxu0 }
 0x3af   : > { %v1338_v28 = vadd.f32 %v1491_v26, %v1337_v27  ;;  %v1603_v29 = vpop.f32.mrb[13].mxu0 }
 0x3b0   : > { %v1340_v30 = vpop.f32.mrb[14].mxu0 }
 0x3b1   : > { %1344 = vst.msk [vmem:[%s330_s27] sm:$0xff] %vm1343_vm4, %v1338_v28  ;;  %v1604_v31 = vpop.f32.mrb[15].mxu0 }
 0x3b2 PF: > { %s19_s30 = sadd.s32 1, %s1711_s30  }
 0x3b3   : > { %p16_p4 = scmp.ge.s32.totalorder %s19_s30, 4  }
 0x3b5   :  { %18 = sbr.rel (!%p16_p4) target bundleno = 1 (0x1), region = 86 }

</bundles_post_ra>
